<compile_context>
chip_gen: v5e
topology: v5e:2x2
jax: 0.10.0
libtpu: 0.0.40
codegen_flags: <defaults>
</compile_context>

<pallas_src>
import functools

import jax
import jax.numpy as jnp
from jax.experimental import pallas as pl
from jax.experimental.pallas import tpu as pltpu

_MIB = 1024 * 1024


def _layernorm_kernel(alpha_ref, bias_ref, x_ref, o_ref, *, eps, hidden):
    # x_ref block: (tile_rows, hidden); reduce along the lane (last) axis.
    x = x_ref[...].astype(jnp.float32)

    mean = jnp.mean(x, axis=-1, keepdims=True)

    # torch.std default is the unbiased estimator (divide by N-1).
    # (x - mean) is consumed directly by the reduction here and recomputed for
    # the output below, so no full-block f32 `diff` temporary has to stay live
    # across the sqrt/reciprocal.
    var = jnp.sum(jnp.square(x - mean), axis=-1, keepdims=True) / (hidden - 1)
    std = jnp.sqrt(var)

    # eps is added to std (NOT variance) to match the PyTorch source exactly.
    # approx=False preserves exact-division numerics; this kernel is DMA-bound,
    # so the EUP/divide path is free-slot work anyway.
    inv = pl.reciprocal(std + eps, approx=False)
    scale = alpha_ref[0] * inv            # per-row scale; alpha folded in

    # Recompute (x - mean): numerically identical to the reference
    # alpha*(x-mean)/(std+eps)+bias, one mul + one add per element.
    o_ref[...] = ((x - mean) * scale + bias_ref[0]).astype(o_ref.dtype)


def _tpu_vmem_capacity_bytes():
    """Per-core VMEM capacity. Conservative 64 MiB (v7x size) fallback."""
    try:
        return int(pltpu.get_tpu_info().vmem_capacity_bytes)
    except Exception:
        return 64 * _MIB


def _pick_tile_rows(n_rows, hidden, dtype, vmem_tile_budget_bytes):
    """Largest row tile fitting the VMEM budget, with a ~2 MiB-per-block floor
    (amortize per-grid-step overhead). No artificial row cap."""
    itemsize = jnp.dtype(dtype).itemsize
    # Per-row VMEM footprint estimate:
    #   2x double-buffered input + 2x double-buffered output (stored dtype)
    #   + ~1 f32 working copy inside the kernel (upcast / streamed (x-mean)).
    bytes_per_row = hidden * (4 * itemsize + 4)
    if itemsize < 4:
        # bf16/fp16: cast + retile temporaries the formula doesn't count.
        bytes_per_row = int(bytes_per_row * 1.25)

    tile_rows = vmem_tile_budget_bytes // max(bytes_per_row, 1)
    tile_rows = max(8, (tile_rows // 8) * 8)

    # Floor: at least ~2 MiB of input bytes per block.
    min_rows = -(-(2 * _MIB) // max(hidden * itemsize, 1))
    min_rows = ((min_rows + 7) // 8) * 8
    tile_rows = max(tile_rows, min_rows)

    # Never bigger than the (8-row rounded) problem itself.
    rows_rounded = ((n_rows + 7) // 8) * 8
    return max(8, min(tile_rows, rows_rounded))


def _even_grid_tile_rows(n_rows, tile_rows):
    """Shrink tile_rows (multiple of 8) so cdiv(n_rows, tile_rows) is even and
    >= 2, keeping the 'parallel' row grid balanced across v7x's two cores."""
    if n_rows <= 8:
        return tile_rows
    steps = -(-n_rows // tile_rows)
    while (steps < 2 or steps % 2 != 0) and tile_rows > 8:
        target = max(2, steps + 1 if steps % 2 else steps)
        new_tile = ((-(-n_rows // target) + 7) // 8) * 8
        if new_tile >= tile_rows:
            new_tile = tile_rows - 8
        tile_rows = max(8, new_tile)
        steps = -(-n_rows // tile_rows)
    return tile_rows


def layer_normalisation(x, alpha, bias, eps=1e-6, *, tile_rows=None,
                        vmem_tile_budget_bytes=None, vmem_limit_bytes=None):
    """x: (..., hidden). alpha, bias: shape-(1,) scalar params."""
    orig_shape = x.shape
    hidden = orig_shape[-1]
    if hidden < 2:
        # torch.std's unbiased estimator divides by (hidden - 1).
        raise ValueError("LayerNormalisation requires hidden >= 2.")
    x2d = x.reshape(-1, hidden)
    n_rows = x2d.shape[0]

    # Generation-aware VMEM policy (v5e/v6e: 128 MiB per core, v7x: 64 MiB).
    vmem_cap = _tpu_vmem_capacity_bytes()
    if vmem_tile_budget_bytes is None:
        vmem_tile_budget_bytes = int(0.35 * vmem_cap)
    if vmem_limit_bytes is None:
        vmem_limit_bytes = int(0.72 * vmem_cap)
    # Heuristic: 64 MiB per-core VMEM <=> v7x <=> 2 TensorCores per chip.
    two_tensorcores = vmem_cap <= 64 * _MIB

    if tile_rows is None:
        tile_rows = _pick_tile_rows(n_rows, hidden, x.dtype,
                                    vmem_tile_budget_bytes)
        if two_tensorcores:
            tile_rows = _even_grid_tile_rows(n_rows, tile_rows)

    grid = (pl.cdiv(n_rows, tile_rows),)

    kernel = functools.partial(_layernorm_kernel, eps=eps, hidden=hidden)

    out2d = pl.pallas_call(
        kernel,
        out_shape=jax.ShapeDtypeStruct((n_rows, hidden), x.dtype),
        grid=grid,
        in_specs=[
            pl.BlockSpec(memory_space=pltpu.SMEM),  # alpha (1,)
            pl.BlockSpec(memory_space=pltpu.SMEM),  # bias  (1,)
            pl.BlockSpec((tile_rows, hidden), lambda i: (i, 0)),
        ],
        out_specs=pl.BlockSpec((tile_rows, hidden), lambda i: (i, 0)),
        compiler_params=pltpu.CompilerParams(
            dimension_semantics=("parallel",),
            vmem_limit_bytes=vmem_limit_bytes,
        ),
    )(alpha, bias, x2d)

    return out2d.reshape(orig_shape)


if __name__ == "__main__":
    key = jax.random.PRNGKey(0)
    batch, seq, hidden = 2, 8, 32
    x = jax.random.normal(key, (batch, seq, hidden), dtype=jnp.float32)

    # Deterministic parameter init, matching nn.Parameter(torch.ones(1)).
    alpha = jnp.ones((1,), dtype=jnp.float32)
    bias = jnp.ones((1,), dtype=jnp.float32)
    eps = 1e-6

    out = layer_normalisation(x, alpha, bias, eps)
    out = jax.block_until_ready(out)

    # Pure-JAX reference check (unbiased std, like torch.std).
    mean = jnp.mean(x, axis=-1, keepdims=True)
    std = jnp.sqrt(
        jnp.sum((x - mean) ** 2, axis=-1, keepdims=True) / (hidden - 1)
    )
    ref = alpha[0] * (x - mean) / (std + eps) + bias[0]
    assert jnp.allclose(out, ref, atol=1e-5, rtol=1e-5), "mismatch vs reference"

    print("KERNEL_OK")
</pallas_src>

<mosaic_0001>
module attributes {stable_mosaic.version = 11 : i64} {
  func.func @_layernorm_kernel(%arg0: i32, %arg1: memref<1xf32, #tpu.memory_space<smem>>, %arg2: memref<1xf32, #tpu.memory_space<smem>>, %arg3: memref<8x32xf32, #tpu.memory_space<vmem>>, %arg4: memref<8x32xf32, #tpu.memory_space<vmem>>) attributes {dimension_semantics = [#tpu.dimension_semantics<parallel>], iteration_bounds = array<i64: 2>, scalar_prefetch = 0 : i64, scratch_operands = 0 : i64, tpu.core_type = #tpu.core_type<tc>, window_params = [{transform_indices = @transform_0, window_bounds = array<i64: 1>}, {transform_indices = @transform_1, window_bounds = array<i64: 1>}, {transform_indices = @transform_2, window_bounds = array<i64: 8, 32>}, {transform_indices = @transform_3, window_bounds = array<i64: 8, 32>}]} {
    %c0 = arith.constant 0 : index
    %c0_0 = arith.constant 0 : index
    %0 = vector.load %arg3[%c0, %c0_0] : memref<8x32xf32, #tpu.memory_space<vmem>>, vector<8x32xf32>
    %cst = arith.constant dense<0.000000e+00> : vector<8xf32>
    %1 = vector.multi_reduction <add>, %0, %cst [1] : vector<8x32xf32> to vector<8xf32>
    %2 = vector.shape_cast %1 : vector<8xf32> to vector<8x1xf32>
    %cst_1 = arith.constant 3.200000e+01 : f32
    %3 = vector.broadcast %cst_1 : f32 to vector<8x1xf32>
    %4 = arith.divf %2, %3 : vector<8x1xf32>
    %5 = vector.broadcast %4 : vector<8x1xf32> to vector<8x32xf32>
    %6 = arith.subf %0, %5 : vector<8x32xf32>
    %7 = arith.mulf %6, %6 : vector<8x32xf32>
    %cst_2 = arith.constant dense<0.000000e+00> : vector<8xf32>
    %8 = vector.multi_reduction <add>, %7, %cst_2 [1] : vector<8x32xf32> to vector<8xf32>
    %9 = vector.shape_cast %8 : vector<8xf32> to vector<8x1xf32>
    %cst_3 = arith.constant 3.100000e+01 : f32
    %10 = vector.broadcast %cst_3 : f32 to vector<8x1xf32>
    %11 = arith.divf %9, %10 : vector<8x1xf32>
    %12 = math.sqrt %11 : vector<8x1xf32>
    %cst_4 = arith.constant 9.99999997E-7 : f32
    %13 = vector.broadcast %cst_4 : f32 to vector<8x1xf32>
    %14 = arith.addf %12, %13 : vector<8x1xf32>
    %15 = tpu.reciprocal %14 : vector<8x1xf32> -> vector<8x1xf32>
    %c0_5 = arith.constant 0 : index
    %16 = memref.load %arg1[%c0_5] : memref<1xf32, #tpu.memory_space<smem>>
    %17 = vector.broadcast %16 : f32 to vector<8x1xf32>
    %18 = arith.mulf %17, %15 : vector<8x1xf32>
    %19 = vector.broadcast %4 : vector<8x1xf32> to vector<8x32xf32>
    %20 = arith.subf %0, %19 : vector<8x32xf32>
    %21 = vector.broadcast %18 : vector<8x1xf32> to vector<8x32xf32>
    %22 = arith.mulf %20, %21 : vector<8x32xf32>
    %c0_6 = arith.constant 0 : index
    %23 = memref.load %arg2[%c0_6] : memref<1xf32, #tpu.memory_space<smem>>
    %24 = vector.broadcast %23 : f32 to vector<8x32xf32>
    %25 = arith.addf %22, %24 : vector<8x32xf32>
    %c0_7 = arith.constant 0 : index
    %c0_8 = arith.constant 0 : index
    %26 = vector.load %arg4[%c0_7, %c0_8] : memref<8x32xf32, #tpu.memory_space<vmem>>, vector<8x32xf32>
    tpu.vector_store %arg4[%c0_7, %c0_8], %25 {strides = array<i32>} : memref<8x32xf32, #tpu.memory_space<vmem>>, vector<8x32xf32>,
    return
  }
  func.func @transform_0(%arg0: i32) -> i32 {
    %c0_i32 = arith.constant 0 : i32
    %c0_i32_0 = arith.constant 0 : i32
    return %c0_i32 : i32
  }
  func.func @transform_1(%arg0: i32) -> i32 {
    %c0_i32 = arith.constant 0 : i32
    %c0_i32_0 = arith.constant 0 : i32
    return %c0_i32 : i32
  }
  func.func @transform_2(%arg0: i32) -> (i32, i32) {
    %c0_i32 = arith.constant 0 : i32
    %c0_i32_0 = arith.constant 0 : i32
    return %arg0, %c0_i32 : i32, i32
  }
  func.func @transform_3(%arg0: i32) -> (i32, i32) {
    %c0_i32 = arith.constant 0 : i32
    %c0_i32_0 = arith.constant 0 : i32
    return %arg0, %c0_i32 : i32, i32
  }
}

</mosaic_0001>

<bundles_post_ra>
// kernel: tpu_custom_call.1
= control target key start
LH: loop header
LB: loop body
LE: loop exit
PB: predicated region body
PF: predicated region fallthrough
CT: control target
= control target key end

     0   :  { %s665_s0 = inlined_call_operand.<no memory space> [shape: f32[1], index: 0, kind: input, shape index: {}]   ;;  %s666_s1 = inlined_call_operand.<no memory space> [shape: f32[1], index: 1, kind: input, shape index: {}]   ;;  %s667_s2 = inlined_call_operand.hbm [shape: f32[16,32], index: 2, kind: input, shape index: {}]   ;;  %s668_s3 = inlined_call_operand.hbm [shape: f32[16,32], index: 3, kind: output, shape index: {}]  }
   0x1   :  { %8 = sst [smem:[#allocation2]] %s665_s0 }
   0x2   :  { %9 = sst [smem:[#allocation3]] %s666_s1 }
   0x3   :  { %10 = vsyncpa [#allocation5], 0 }
   0x4   :  { %12 = vsyncpa [#allocation5 + $0x1], 0 }
   0x5   :  { %13 = vsyncpa [#allocation6], 0 }
   0x6   :  { %15 = vsyncpa [#allocation6 + $0x1], 0  ;;  %s531_s16 = smov 0   ;;  %s533_s17 = smov 0  }
   0x7   :  { %s535_s18 = smov 0   ;;  %s537_s19 = smov 0  }
   0x8 LB: > { %s552_s0 = sadd.s32 4294967295, %s501_s19   ;;  %s337_s1 = sadd.s32 4294967294, %s501_s19   ;;  %s501_s19 = sphi %s537_s19, %s678_s19   ;;  %s497_s18 = sphi %s535_s18, %s677_s18   ;;  %s493_s17 = sphi %s533_s17, %s676_s17   ;;  %s489_s16 = sphi %s531_s16, %s675_s16  }
   0x9   : > { %s556_s20 = sadd.s32 1, %s501_s19   ;;  %s70_s21 = sadd.s32 1, %s497_s18 }
   0xa   : > { %s67_s22 = ssub.s32 %s501_s19, %s556_s20  ;;  %p77_p0 = scmp.ne.s32.totalorder %s497_s18, %s493_s17 }
   0xb   : > { %p68_p1 = scmp.eq.s32.totalorder %s67_s22, 0  ;;  %p78_p2 = scmp.eq.s32.totalorder %s501_s19, 0 }
   0xc   : > { %p83_p3 = scmp.ne.s32.totalorder %s493_s17, %s489_s16  ;;  %p84_p4 = scmp.eq.s32.totalorder %s552_s0, 0 }
   0xd   : > { %s568_s23 = scalar_select %p68_p1, %s497_s18, %s70_s21  }
   0xe   : > { %p570_p5 = por %p78_p2, %p77_p0  ;;  %p574_p6 = por %p84_p4, %p83_p3 }
   0xf   : > { %p107_p7 = scmp.eq.s32.totalorder %s552_s0, 1  ;;  %p113_p8 = scmp.eq.s32.totalorder %s337_s1, 1 }
  0x10   : > { %p361_p10 = scmp.lt.s32.totalorder %s501_s19, 2  ;;  %s139_s28 = sand.u32 1, %s497_s18  }
  0x11   : > { %p581_p11 = por %p107_p7, %p77_p0  ;;  %p585_p12 = por %p113_p8, %p83_p3 }
  0x12   : > { %s341_s29 = sshll.u32 %s501_s19, 3  ;;  %s340_s30 = sshll.u32 %s139_s28, 3 }
  0x13   : > { %s147_s6 = scalar_lea.hbm %s667_s2, %s341_s29  ;;  %s143_s8 = scalar_lea.vmem [#allocation4], %s340_s30 }
  0x14   : > { %s149_s7 = sshll.u32 %s147_s6, 4  ;;  %s151_s9 = sshll.u32 %s143_s8, 4  ;;  %s150_s7 = int_to_ptr.hbm [resolvable:$true] %s149_s7  ;;  %s152_s9 = int_to_ptr.vmem [resolvable:$true] %s151_s9 }
  0x15   : > { %p596_p13 = pnand %p361_p10, %p570_p5  ;;  %p342_p0 = scmp.ge.s32.totalorder %s501_s19, 1 }
  0x16   : > { %p156_p1 = scmp.lt.s32.totalorder %s501_s19, 3  ;;  %s140_s11 = scalar_lea.sflag [#allocation5], %s139_s28 }
  0x17   : > { %s405_s12 = sshra.s32 %s150_s7, 4  ;;  %p409_p3 = pneg %p596_p13  ;;  %s406_s12 = int_to_ptr.hbm [resolvable:$true] %s405_s12 }
  0x18   : > { %s407_s13 = scalar_lea.hbm %s406_s12, 8  ;;  %s412_s1 = scalar_lea.hbm %s667_s2, 16 }
  0x19   : > { %p408_p2 = scmp.ne.s32.totalorder %s406_s12, %s407_s13  ;;  %p413_p5 = scmp.lt.s32.totalorder %s406_s12, %s667_s2 }
  0x1a   : > { %p414_p8 = scmp.lt.s32.totalorder %s412_s1, %s407_s13 }
  0x1b   : > { %p410_p4 = pnand %p409_p3, %p408_p2 }
  0x1c   : > { %p415_p10 = por %p414_p8, %p413_p5 }
  0x1d   : > { %p411_p7 = pneg %p410_p4 }
  0x1f   : > { %p416_p9 = pnand %p415_p10, %p411_p7 }
  0x21   : > { %419 = shalt.err (!%p416_p9)
}
  0x22   : > { %356 = dma.hbm_to_vmem [thread:$0]  (!%p596_p13), %s150_s7, 128, %s152_s9, %s140_s11  }
  0x23   : > { %p157_p2 = pnand %p342_p0, %p156_p1 }
  0x24   : > { %s617_s24 = sand.u32 (!%p157_p2), 1, %s493_s17  }
  0x25   : > { %160 = sbr.rel (%p157_p2) target bundleno = 335 (0x14f), region = 32  ;;  %s343_s28 = sshll.u32 (!%p157_p2), %s617_s24, 3 }
  0x26   : > { %s163_s29 = scalar_lea.sflag (!%p157_p2), [#allocation5], %s617_s24  ;;  %s166_s30 = scalar_lea.vmem (!%p157_p2), [#allocation4], %s343_s28 }
  0x2a   : > { %480 = dma.done.wait (%p574_p6), %s163_s29, 128  }
  0x2b   : > { %482 = vsyncadd (%p574_p6), %s163_s29, 4294967168  ;;  %vm191_vm0 = vcmask 261120   ;;  %v190_v0 = vld [vmem:[%s166_s30] sm:$0xff]  ;;  %v503_v2 = vmov 32.0   ;;  %v504_v14 = vmov 31.0   ;;  %s243_s25 = sld [smem:[#allocation2]] }
  0x2c   : > { %v192_v1 = vsel %vm191_vm0, %v190_v0, 0.0  ;;  %397 = vrcp.f32 %v503_v2  ;;  %s247_s4 = sld [smem:[#allocation3]]  ;;  %s346_s5 = sshll.u32 %s552_s0, 3 }
  0x2d   : > { %193 = vadd.xlane.f32.xlu0 %v192_v1  ;;  %399 = vrcp.f32 %v504_v14  ;;  %s262_s8 = scalar_lea.hbm %s668_s3, %s346_s5  ;;  %s189_s9 = scalar_lea.vmem [#allocation7], %s343_s28 }
  0x2e   : > { %s264_s10 = sshll.u32 %s189_s9, 4  ;;  %s266_s0 = sshll.u32 %s262_s8, 4  ;;  %s265_s10 = int_to_ptr.vmem [resolvable:$true] %s264_s10  ;;  %s267_s0 = int_to_ptr.hbm [resolvable:$true] %s266_s0 }
  0x2f   : > { %s252_s11 = scalar_lea.sflag [#allocation6], %s617_s24  ;;  %s449_s12 = sshra.s32 %s267_s0, 4  ;;  %s450_s12 = int_to_ptr.hbm [resolvable:$true] %s449_s12 }
  0x30   : > { %s451_s13 = scalar_lea.hbm %s450_s12, 8  ;;  %s455_s1 = scalar_lea.hbm %s668_s3, 16 }
  0x31   : > { %v244_v41 = vstv %s243_s25  ;;  %p452_p6 = scmp.ne.s32.totalorder %s450_s12, %s451_s13  ;;  %p456_p0 = scmp.lt.s32.totalorder %s450_s12, %s668_s3 }
  0x32   : > { %v398_v3 = vpop.eup %397  ;;  %v248_v46 = vstv %s247_s4  ;;  %p457_p1 = scmp.lt.s32.totalorder %s455_s1, %s451_s13 }
  0x33   : > { %v196_v4 = vmul.f32 32.0, %v398_v3  ;;  %vm200_vm1 = vweird.f32 %v398_v3  ;;  %v400_v15 = vpop.eup %399  ;;  %p453_p9 = pnand %p452_p6, %p581_p11 }
  0x34   : > { %v209_v16 = vmul.f32 31.0, %v400_v15  ;;  %vm213_vm2 = vweird.f32 %v400_v15  ;;  %p458_p3 = por %p457_p1, %p456_p0 }
  0x35   : > { %v197_v5 = vsub.f32 1.0, %v196_v4  ;;  %p454_p13 = pneg %p453_p9 }
  0x36   : > { %v210_v17 = vsub.f32 1.0, %v209_v16 }
  0x37   : > { %v198_v6 = vmul.f32 %v398_v3, %v197_v5  ;;  %p459_p4 = pnand %p458_p3, %p454_p13 }
  0x38   : > { %v211_v18 = vmul.f32 %v400_v15, %v210_v17 }
  0x39   : > { %v199_v7 = vadd.f32 %v398_v3, %v198_v6 }
  0x3a   : > { %v212_v19 = vadd.f32 %v400_v15, %v211_v18 }
  0x3b   : > { %v201_v8 = vsel %vm200_vm1, %v398_v3, %v199_v7 }
  0x3c   : > { %v214_v20 = vsel %vm213_vm2, %v400_v15, %v212_v19 }
  0xa0   : > { %v194_v9 = vpop.xlane.xlu0 %193 }
  0xa1   : > { %v202_v10 = vmul.f32 %v201_v8, %v194_v9 }
  0xa3   : > { %v203_v11 = vsub.f32 %v190_v0, %v202_v10 }
  0xa5   : > { %v204_v12 = vmul.f32 %v203_v11, %v203_v11 }
  0xa7   : > { %v205_v13 = vsel %vm191_vm0, %v204_v12, 0.0 }
  0xa8   : > { %206 = vadd.xlane.f32.xlu0 %v205_v13 }
 0x11b   : > { %v207_v21 = vpop.xlane.xlu0 %206 }
 0x11c   : > { %v215_v22 = vmul.f32 %v214_v20, %v207_v21 }
 0x11e   : > { %401 = vrsqrt.f32 %v215_v22  ;;  %vm223_vm3 = vcmp.eq.f32.partialorder %v215_v22, inf  ;;  %v226_v30 = vand.u32 2147483648, %v215_v22  ;;  %vm225_vm4 = vcmp.eq.f32.partialorder %v215_v22, 0.0 }
 0x124   : > { %v402_v23 = vpop.eup %401 }
 0x125   : > { %v217_v24 = vmul.f32 %v402_v23, %v215_v22 }
 0x127   : > { %v218_v25 = vmul.f32 %v402_v23, %v217_v24 }
 0x129   : > { %v219_v26 = vmul.f32 0.5, %v218_v25 }
 0x12b   : > { %v220_v27 = vsub.f32 1.5, %v219_v26 }
 0x12d   : > { %v221_v28 = vmul.f32 %v402_v23, %v220_v27 }
 0x12f   : > { %v222_v29 = vmul.f32 %v221_v28, %v215_v22 }
 0x131   : > { %v224_v31 = vsel %vm223_vm3, %v215_v22, %v222_v29 }
 0x132   : > { %v227_v32 = vsel %vm225_vm4, %v226_v30, %v224_v31 }
 0x133   : > { %v228_v33 = vadd.f32 1e-06, %v227_v32 }
 0x135   : > { %403 = vrcp.f32 %v228_v33  ;;  %v240_v37 = vand.u32 2147483648, %v228_v33  ;;  %v238_v39 = vand.u32 2147483647, %v228_v33  ;;  %vm234_vm6 = vweird.f32 %v228_v33 }
 0x137   : > { %v241_v42 = vor.u32 1.1754944e-38, %v240_v37  ;;  %vm239_vm8 = vcmp.eq.f32.partialorder %v238_v39, 8.507059e+37 }
 0x13b   : > { %v404_v34 = vpop.eup %403 }
 0x13c   : > { %v230_v35 = vmul.f32 %v404_v34, %v228_v33  ;;  %vm235_vm5 = vweird.f32 %v404_v34 }
 0x13d   : > { %vm236_vm7 = vmor %vm234_vm6, %vm235_vm5 }
 0x13e   : > { %v231_v36 = vsub.f32 1.0, %v230_v35 }
 0x140   : > { %v232_v38 = vmul.f32 %v404_v34, %v231_v36 }
 0x142   : > { %v233_v40 = vadd.f32 %v404_v34, %v232_v38 }
 0x144   : > { %v237_v43 = vsel %vm236_vm7, %v404_v34, %v233_v40 }
 0x145   : > { %v242_v44 = vsel %vm239_vm8, %v241_v42, %v237_v43 }
 0x146   : > { %v245_v45 = vmul.f32 %v244_v41, %v242_v44 }
 0x148   : > { %v246_v47 = vmul.f32 %v245_v45, %v203_v11 }
 0x14a   : > { %v249_v48 = vadd.f32 %v248_v46, %v246_v47 }
 0x14c   : > { %250 = vst.msk [vmem:[%s189_s9] sm:$0xff] %vm191_vm0, %v249_v48 }
 0x14d   : > { %462 = shalt.err (!%p459_p4)
}
 0x14e   : > { %351 = dma.vmem_to_hbm [thread:$0]  (%p581_p11), %s265_s10, 128, %s267_s0, %s252_s11  }
 0x14f PF: > { %s278_s24 = sand.u32 1, %s489_s16   ;;  %p674_p7 = scmp.ge.s32.totalorder %s501_s19, 2 }
 0x150   : > { %s279_s28 = scalar_lea.sflag [#allocation6], %s278_s24 }
 0x151   : > { %p358_p5 = pnand %p674_p7, %p585_p12 }
 0x153   : > { %p359_p8 = pneg %p358_p5 }
 0x155   : > { %484 = dma.done.wait (%p359_p8), %s279_s28, 128  }
 0x156   : > { %486 = vsyncadd (%p359_p8), %s279_s28, 4294967168  ;;  %p18_p10 = scmp.ge.s32.totalorder %s556_s20, 4   ;;  %s675_s16 = smov %s493_s17 }
 0x157   : > { %s676_s17 = smov %s497_s18  ;;  %s677_s18 = smov %s568_s23 }
 0x158   : > { %s678_s19 = smov %s556_s20  ;;  %20 = sbr.rel (!%p18_p10) target bundleno = 8 (0x8), region = 77 }
 0x15d   :  { %285 = vsyncpa [#allocation5], 1 }
 0x15e   :  { %287 = vsyncpa [#allocation5 + $0x1], 1 }
 0x15f   :  { %288 = vsyncpa [#allocation6], 1 }
 0x160   :  { %290 = vsyncpa [#allocation6 + $0x1], 1 }

</bundles_post_ra>
